<compile_context>
chip_gen: v7x
topology: tpu7x:2x2x1
jax: 0.10.0
libtpu: 0.0.40
codegen_flags: <defaults>
</compile_context>

<pallas_src>
import jax
import jax.numpy as jnp
from jax.experimental import pallas as pl
from jax.experimental.pallas import tpu as pltpu

_MIB = 1024 * 1024


def _round_up(x: int, m: int) -> int:
    return ((x + m - 1) // m) * m


def _sublane(dtype) -> int:
    """Sublane packing of a dtype: 8 rows for 4-byte, 16 for 2-byte, 32 for 1-byte."""
    return max(8, 32 // jnp.dtype(dtype).itemsize)


# -----------------------------------------------------------------------------
# Tested feature flag for single-buffered (pl.Buffered(1)) grid-invariant blocks
# -----------------------------------------------------------------------------
_SINGLE_BUFFER_OK = None


def _probe_single_buffer(x, w):
    def body(x_ref, w_ref, o_ref):
        o_ref[...] = x_ref[...] + w_ref[...]

    return pl.pallas_call(
        body,
        out_shape=jax.ShapeDtypeStruct((16, 128), jnp.float32),
        grid_spec=pltpu.PrefetchScalarGridSpec(
            num_scalar_prefetch=0,
            grid=(2, 1),
            in_specs=[
                pl.BlockSpec((8, 128), lambda i, j: (i, 0)),
                pl.BlockSpec((8, 128), lambda i, j: (0, 0),
                             pipeline_mode=pl.Buffered(1)),
            ],
            out_specs=pl.BlockSpec((8, 128), lambda i, j: (i, 0)),
        ),
        compiler_params=pltpu.CompilerParams(
            dimension_semantics=("parallel", "parallel")),
    )(x, w)


def _single_buffer_supported() -> bool:
    """Cached feature probe for `pipeline_mode=pl.Buffered(1)`.

    AOT-compiles a tiny kernel once (abstract inputs, no device execution).
    This replaces the previous broad try/except around the *production* kernel:
    real lowering errors are never masked and the real kernel never recompiles.
    """
    global _SINGLE_BUFFER_OK
    if _SINGLE_BUFFER_OK is None:
        if not hasattr(pl, "Buffered"):
            _SINGLE_BUFFER_OK = False
        else:
            try:
                jax.jit(_probe_single_buffer).lower(
                    jax.ShapeDtypeStruct((16, 128), jnp.float32),
                    jax.ShapeDtypeStruct((8, 128), jnp.float32),
                ).compile()
                _SINGLE_BUFFER_OK = True
            except Exception:  # narrow scope: tiny probe only, result cached
                _SINGLE_BUFFER_OK = False
    return _SINGLE_BUFFER_OK


def _maybe_single_buffered(block_shape, index_map, invariant: bool):
    """Grid-invariant blocks don't need a second pipeline buffer (saves VMEM)."""
    if invariant and _single_buffer_supported():
        return pl.BlockSpec(block_shape, index_map, pipeline_mode=pl.Buffered(1))
    return pl.BlockSpec(block_shape, index_map)


# -----------------------------------------------------------------------------
# Kernels
# -----------------------------------------------------------------------------
def _proj_kernel(x_ref, w_ref, b_ref, o_ref):
    # One (node-tile, out-tile) block per grid step: o = x @ W + b.
    acc = jnp.dot(x_ref[...], w_ref[...], preferred_element_type=jnp.float32)
    o_ref[...] = (acc + b_ref[...].astype(jnp.float32)).astype(o_ref.dtype)


def _proj_kernel_ktiled(x_ref, w_ref, b_ref, o_ref, acc_ref):
    # in_dim (K) tiled as the trailing "arbitrary" grid axis: accumulate in an
    # f32 VMEM scratch, write the output block on the last K step.
    k = pl.program_id(2)

    @pl.when(k == 0)
    def _init():
        acc_ref[...] = jnp.zeros_like(acc_ref)

    acc_ref[...] += jnp.dot(x_ref[...], w_ref[...],
                            preferred_element_type=jnp.float32)

    @pl.when(k == pl.num_programs(2) - 1)
    def _finalize():
        o_ref[...] = (acc_ref[...] + b_ref[...].astype(jnp.float32)
                      ).astype(o_ref.dtype)


# -----------------------------------------------------------------------------
# Tile planning
# -----------------------------------------------------------------------------
def _plan_tiles(n, in_dim, out_p, in_itemsize, out_itemsize, x_sublane, w_sublane):
    """Pick (node_tile tm, out_tile tn, k_tile tk).

    Targets ~4 MiB of HBM traffic per grid step and keeps the per-step VMEM
    footprint (lane-padded, double-buffered feat/out blocks + weight + bias +
    accumulator) under a conservative budget that fits v7x's 64 MiB physical /
    32 MiB default-scoped VMEM as well as v5e/v6e.
    """
    VMEM_BLOCK_BUDGET = 20 * _MIB
    WEIGHT_BLOCK_BUDGET = 8 * _MIB
    HBM_STEP_TARGET = 4 * _MIB

    # --- out_dim tile: largest divisor of out_p <= 512 keeps stores lane-dense
    # and minimizes how often feat must be re-read across column tiles.
    if out_p <= 512:
        tn = out_p
    else:
        tn = next(c for c in (512, 384, 256, 128) if out_p % c == 0)

    # --- K tile: only when the weight block is too big for VMEM AND in_dim has
    # a clean multiple-of-128 divisor (a ragged K tile would fold garbage lanes
    # into the accumulation of valid outputs).
    def _pick_tk(tn_):
        if _round_up(in_dim, w_sublane) * tn_ * in_itemsize <= WEIGHT_BLOCK_BUDGET:
            return in_dim
        for cand in (2048, 1024, 512, 256, 128):
            if in_dim % cand == 0 and cand * tn_ * in_itemsize <= WEIGHT_BLOCK_BUDGET:
                return cand
        return in_dim  # no clean divisor: keep full K (scoped VMEM raised later)

    tk = _pick_tk(tn)
    if (tk == in_dim and tn > 128
            and _round_up(in_dim, w_sublane) * tn * in_itemsize > WEIGHT_BLOCK_BUDGET):
        tn = 128                      # shrink the column tile, retry K tiling
        tk = _pick_tk(tn)

    # --- node tile: size from per-step HBM bytes, not a fixed constant.
    per_row_hbm = in_dim * in_itemsize + out_p * out_itemsize
    tm = HBM_STEP_TARGET // max(per_row_hbm, 1)

    # VMEM cap with lane-padding accounting: a (tm, tk<128) block still
    # occupies tm * 128 lanes in VMEM; feat/out blocks are double buffered;
    # weight/bias budgeted conservatively at 2 buffers.
    x_lanes = _round_up(tk, 128)
    per_row_vmem = (2 * x_lanes * in_itemsize + 2 * tn * out_itemsize
                    + (4 * tn if tk != in_dim else 0))
    fixed_vmem = 2 * _round_up(tk, w_sublane) * tn * in_itemsize + 2 * 8 * tn * 4
    tm = min(tm, max(x_sublane, (VMEM_BLOCK_BUDGET - fixed_vmem) // per_row_vmem))

    # Keep enough row-grid steps to feed both v7x TensorCores (no-op on
    # single-TC v5e/v6e), and never exceed the (sublane-rounded) row count.
    if n >= 8 * x_sublane:
        tm = min(tm, _round_up(-(-n // 8), x_sublane))
    elif n >= 2 * x_sublane:
        tm = min(tm, _round_up(-(-n // 2), x_sublane))
    tm = min(tm, _round_up(n, x_sublane))
    tm = max(x_sublane, (tm // x_sublane) * x_sublane)
    return tm, tn, tk


# -----------------------------------------------------------------------------
# Forward
# -----------------------------------------------------------------------------
def net_forward(feat, weight, bias, *, compute_dtype=None, node_tile=None,
                out_tile=None, k_tile=None, return_padded=False):
    """Per-node projection: out = feat @ weight + bias.

    feat:   [N, in_dim] node features (g.ndata['feat'])
    weight: [in_dim, out_dim]
    bias:   [out_dim] or [1, out_dim]
    compute_dtype: optional dtype for feat/weight inside the kernel (e.g.
        jnp.bfloat16 halves input HBM bytes; accumulation is always f32).
        Default None keeps the caller's dtype -- casting here would itself be a
        full HBM copy of feat, so prefer storing features in bf16 upstream.
    return_padded: if True and out_dim % 128 != 0, return the lane-padded
        [N, round_up(out_dim, 128)] buffer and skip the unpad copy.

    Returns [N, out_dim] in feat's original dtype (FloatTensor contract).
    """
    n, in_dim = feat.shape
    in_dim_w, out_dim = weight.shape
    assert in_dim == in_dim_w, "feat / weight inner dims must match"
    out_dtype = feat.dtype

    bias = jnp.asarray(bias).reshape(1, out_dim)

    if compute_dtype is not None:
        compute_dtype = jnp.dtype(compute_dtype)
        if feat.dtype != compute_dtype:
            feat = feat.astype(compute_dtype)
        if weight.dtype != compute_dtype:
            weight = weight.astype(compute_dtype)

    in_itemsize = jnp.dtype(feat.dtype).itemsize
    out_itemsize = jnp.dtype(out_dtype).itemsize
    x_sublane = _sublane(feat.dtype)
    w_sublane = _sublane(weight.dtype)

    # Lane-dense output: pad out_dim to a multiple of 128 (weight/bias only --
    # they are small; feat is never padded or copied).
    out_p = _round_up(out_dim, 128)
    if out_p != out_dim:
        weight = jnp.pad(weight, ((0, 0), (0, out_p - out_dim)))
        bias = jnp.pad(bias, ((0, 0), (0, out_p - out_dim)))

    tm, tn, tk = _plan_tiles(n, in_dim, out_p, in_itemsize, out_itemsize,
                             x_sublane, w_sublane)
    if out_tile is not None:
        assert out_tile % 128 == 0 and out_p % out_tile == 0
        tn = out_tile
    if k_tile is not None:
        assert k_tile % 128 == 0 and in_dim % k_tile == 0
        tk = k_tile
    if node_tile is not None:
        tm = max(x_sublane, _round_up(node_tile, x_sublane))

    ni = -(-n // tm)            # ragged last node tile: no wrapper-side padding
    nj = out_p // tn
    nk = in_dim // tk
    k_tiled = nk > 1

    if not k_tiled:
        grid = (ni, nj)
        in_specs = [
            pl.BlockSpec((tm, in_dim), lambda i, j: (i, 0)),
            _maybe_single_buffered((in_dim, tn), lambda i, j: (0, j), nj == 1),
            _maybe_single_buffered((1, tn), lambda i, j: (0, j), nj == 1),
        ]
        out_specs = pl.BlockSpec((tm, tn), lambda i, j: (i, j))
        scratch_shapes = ()
        kernel = _proj_kernel
        dims = ("parallel", "parallel")
    else:
        grid = (ni, nj, nk)
        in_specs = [
            pl.BlockSpec((tm, tk), lambda i, j, k: (i, k)),
            pl.BlockSpec((tk, tn), lambda i, j, k: (k, j)),
            _maybe_single_buffered((1, tn), lambda i, j, k: (0, j), nj == 1),
        ]
        out_specs = pl.BlockSpec((tm, tn), lambda i, j, k: (i, j))
        scratch_shapes = (pltpu.VMEM((tm, tn), jnp.float32),)
        kernel = _proj_kernel_ktiled
        dims = ("parallel", "parallel", "arbitrary")

    # Scoped-VMEM limit from the actual (lane-padded) block footprint: raises
    # v5e's 16 MiB default, stays below v7x's 64 MiB physical VMEM.
    x_lanes = _round_up(tk, 128)
    w_bufs = 1 if (nj == 1 and nk == 1) else 2
    vmem_est = (2 * tm * x_lanes * in_itemsize
                + 2 * tm * tn * out_itemsize
                + w_bufs * _round_up(tk, w_sublane) * tn * in_itemsize
                + 2 * 8 * tn * jnp.dtype(bias.dtype).itemsize
                + (tm * tn * 4 if k_tiled else 0))
    vmem_limit = int(min(max(32 * _MIB, vmem_est * 3 // 2 + 8 * _MIB), 56 * _MIB))

    # Honest traffic estimate for the pallas_call itself (no phantom copies).
    x_reads = nj if k_tiled else 1      # invariant blocks are not re-fetched
    w_reads = 1 if (nj == 1 and nk == 1) else ni
    cost = pl.CostEstimate(
        flops=2 * n * in_dim * out_p,
        transcendentals=0,
        bytes_accessed=int(x_reads * n * in_dim * in_itemsize
                           + w_reads * in_dim * out_p * in_itemsize
                           + out_p * jnp.dtype(bias.dtype).itemsize
                           + n * out_p * out_itemsize),
    )

    out = pl.pallas_call(
        kernel,
        out_shape=jax.ShapeDtypeStruct((n, out_p), out_dtype),
        grid_spec=pltpu.PrefetchScalarGridSpec(
            num_scalar_prefetch=0,
            grid=grid,
            in_specs=in_specs,
            out_specs=out_specs,
            scratch_shapes=scratch_shapes,
        ),
        compiler_params=pltpu.CompilerParams(
            dimension_semantics=dims,
            vmem_limit_bytes=vmem_limit,
        ),
        cost_estimate=cost,
    )(feat, weight, bias)

    if return_padded or out_p == out_dim:
        return out                 # fast path: no extra HBM copy
    return out[:, :out_dim]        # lane-unpad only when out_dim % 128 != 0


if __name__ == "__main__":
    # Small, deterministic problem consistent with the module's contract.
    # num_nodes deliberately NOT a multiple of the node tile (ragged last tile).
    num_nodes = 150
    in_dim = 32
    out_dim = 128          # multiple of 128 -> lane-dense fast path (no slice)

    key = jax.random.PRNGKey(0)
    k_feat, k_w, k_b = jax.random.split(key, 3)

    feat = jax.random.normal(k_feat, (num_nodes, in_dim), dtype=jnp.float32)
    weight = jax.random.normal(k_w, (in_dim, out_dim), dtype=jnp.float32) / jnp.sqrt(in_dim)
    bias = jax.random.normal(k_b, (out_dim,), dtype=jnp.float32) * 0.01

    ref = feat @ weight + bias[None, :]

    # 1) f32 path (tight check), fast-path output, ragged last node tile.
    out = jax.block_until_ready(net_forward(feat, weight, bias))
    assert out.shape == (num_nodes, out_dim)
    assert jnp.allclose(out, ref, atol=1e-5, rtol=1e-5)

    # 2) bf16 inputs (bandwidth-optimized path), f32 accumulation.
    out_bf16 = jax.block_until_ready(
        net_forward(feat, weight, bias, compute_dtype=jnp.bfloat16))
    assert out_bf16.shape == (num_nodes, out_dim)
    assert jnp.allclose(out_bf16, ref, atol=5e-2, rtol=5e-2)

    # 3) out_dim not a multiple of 128 exercises lane padding + unpad slice.
    out_np = jax.block_until_ready(net_forward(feat, weight[:, :60], bias[:60]))
    assert out_np.shape == (num_nodes, 60)
    assert jnp.allclose(out_np, ref[:, :60], atol=1e-5, rtol=1e-5)

    # 4) Exercise the K-tiled (accumulator) and out_dim-tiled path with small
    #    shapes via explicit tile overrides.
    in_dim2, out_dim2 = 256, 256
    k2f, k2w, k2b = jax.random.split(jax.random.PRNGKey(1), 3)
    feat2 = jax.random.normal(k2f, (num_nodes, in_dim2), dtype=jnp.float32)
    weight2 = jax.random.normal(k2w, (in_dim2, out_dim2), dtype=jnp.float32) / jnp.sqrt(in_dim2)
    bias2 = jax.random.normal(k2b, (out_dim2,), dtype=jnp.float32) * 0.01
    ref2 = feat2 @ weight2 + bias2[None, :]
    out2 = jax.block_until_ready(
        net_forward(feat2, weight2, bias2, out_tile=128, k_tile=128))
    assert out2.shape == (num_nodes, out_dim2)
    assert jnp.allclose(out2, ref2, atol=1e-3, rtol=1e-3)

    print("KERNEL_OK")
</pallas_src>

<mosaic_0001>
module attributes {stable_mosaic.version = 11 : i64} {
  func.func @_proj_kernel(%arg0: i32, %arg1: i32, %arg2: memref<24x32xf32, #tpu.memory_space<vmem>>, %arg3: memref<32x128xf32, #tpu.memory_space<vmem>>, %arg4: memref<1x128xf32, #tpu.memory_space<vmem>>, %arg5: memref<24x128xf32, #tpu.memory_space<vmem>>) attributes {dimension_semantics = [#tpu.dimension_semantics<parallel>, #tpu.dimension_semantics<parallel>], iteration_bounds = array<i64: 7, 1>, scalar_prefetch = 0 : i64, scratch_operands = 0 : i64, tpu.core_type = #tpu.core_type<tc>, window_params = [{transform_indices = @transform_0, window_bounds = array<i64: 24, 32>}, {transform_indices = @transform_1, window_bounds = array<i64: 32, 128>}, {transform_indices = @transform_2, window_bounds = array<i64: 1, 128>}, {transform_indices = @transform_3, window_bounds = array<i64: 24, 128>}]} {
    %c0 = arith.constant 0 : index
    %c0_0 = arith.constant 0 : index
    %0 = vector.load %arg2[%c0, %c0_0] : memref<24x32xf32, #tpu.memory_space<vmem>>, vector<24x32xf32>
    %c0_1 = arith.constant 0 : index
    %c0_2 = arith.constant 0 : index
    %1 = vector.load %arg3[%c0_1, %c0_2] : memref<32x128xf32, #tpu.memory_space<vmem>>, vector<32x128xf32>
    %cst = arith.constant dense<0.000000e+00> : vector<24x128xf32>
    %2 = tpu.matmul %0, %1, %cst {dimension_numbers = #tpu.dot_dimension_numbers<[1], [0], [0], [1], [0, 0, 1, 1], [], []>} : vector<24x32xf32>, vector<32x128xf32>, vector<24x128xf32> -> vector<24x128xf32>
    %c0_3 = arith.constant 0 : index
    %c0_4 = arith.constant 0 : index
    %3 = vector.load %arg4[%c0_3, %c0_4] : memref<1x128xf32, #tpu.memory_space<vmem>>, vector<1x128xf32>
    %4 = vector.broadcast %3 : vector<1x128xf32> to vector<24x128xf32>
    %5 = arith.addf %2, %4 : vector<24x128xf32>
    %c0_5 = arith.constant 0 : index
    %c0_6 = arith.constant 0 : index
    %6 = vector.load %arg5[%c0_5, %c0_6] : memref<24x128xf32, #tpu.memory_space<vmem>>, vector<24x128xf32>
    tpu.vector_store %arg5[%c0_5, %c0_6], %5 {strides = array<i32>} : memref<24x128xf32, #tpu.memory_space<vmem>>, vector<24x128xf32>,
    return
  }
  func.func @transform_0(%arg0: i32, %arg1: i32) -> (i32, i32) {
    %c0_i32 = arith.constant 0 : i32
    %c0_i32_0 = arith.constant 0 : i32
    return %arg0, %c0_i32 : i32, i32
  }
  func.func @transform_1(%arg0: i32, %arg1: i32) -> (i32, i32) {
    %c0_i32 = arith.constant 0 : i32
    %c0_i32_0 = arith.constant 0 : i32
    return %c0_i32, %arg1 : i32, i32
  }
  func.func @transform_2(%arg0: i32, %arg1: i32) -> (i32, i32) {
    %c0_i32 = arith.constant 0 : i32
    %c0_i32_0 = arith.constant 0 : i32
    return %c0_i32, %arg1 : i32, i32
  }
  func.func @transform_3(%arg0: i32, %arg1: i32) -> (i32, i32) {
    %c0_i32 = arith.constant 0 : i32
    return %arg0, %arg1 : i32, i32
  }
}

</mosaic_0001>

<bundles_post_ra>
// kernel: tpu_custom_call.1
= control target key start
LH: loop header
LB: loop body
LE: loop exit
PB: predicated region body
PF: predicated region fallthrough
CT: control target
= control target key end

     0   :  { %8 = vsyncpa [#allocation3], 0  ;;  %s835_s0 = inlined_call_operand.vmem [shape: f32[150,32], index: 0, kind: input, shape index: {}]   ;;  %s836_s1 = inlined_call_operand.vmem [shape: f32[32,128], index: 1, kind: input, shape index: {}]   ;;  %s837_s2 = inlined_call_operand.vmem [shape: f32[1,128], index: 2, kind: input, shape index: {}]   ;;  %s838_s3 = inlined_call_operand.hbm [shape: f32[150,128], index: 3, kind: output, shape index: {}]  }
   0x1   :  { %10 = vsyncpa [#allocation3 + $0x1], 0  ;;  %s688_s12 = smov 0   ;;  %s690_s13 = smov 0  }
   0x2   :  { %s692_s14 = smov 0   ;;  %s694_s15 = smov 0  }
   0x3   :  { %s696_s16 = smov 0   ;;  %s698_s17 = smov 0  }
   0x4 LB: > { %s468_s18 = sadd.s32 4294967295, %s660_s17   ;;  %s469_s19 = sadd.s32 4294967294, %s660_s17   ;;  %s660_s17 = sphi %s698_s17, %s16_s17   ;;  %s656_s16 = sphi %s696_s16, %s845_s16   ;;  %s652_s15 = sphi %s694_s15, %s844_s15   ;;  %s648_s14 = sphi %s692_s14, %s843_s14   ;;  %s644_s13 = sphi %s690_s13, %s842_s13   ;;  %s640_s12 = sphi %s688_s12, %s841_s12  }
   0x5   : > { %s28_s20 = sadd.s32 1, %s656_s16  ;;  %s115_s21 = sadd.s32 1, %s648_s14 }
   0x6   : > { %p30_p0 = scmp.ge.s32.totalorder %s28_s20, 7  ;;  %p125_p1 = scmp.ne.s32.totalorder %s648_s14, %s644_s13 }
   0x7   : > { %p126_p2 = scmp.eq.s32.totalorder %s468_s18, 6  ;;  %p131_p3 = scmp.ne.s32.totalorder %s644_s13, %s640_s12 }
   0x8   : > { %s847_s20 = smov (%p30_p0, %s28_s20), 0  ;;  %p132_p5 = scmp.eq.s32.totalorder %s469_s19, 6 }
   0x9   : > { %p728_p4 = por %p126_p2, %p125_p1  ;;  %s110_s23 = ssub.s32 %s656_s16, %s847_s20 }
   0xa   : > { %p474_p6 = scmp.ge.s32.totalorder %s660_s17, 1  ;;  %p113_p7 = scmp.eq.s32.totalorder %s110_s23, 0 }
   0xb   : > { %p735_p8 = por %p132_p5, %p131_p3  ;;  %p180_p9 = scmp.lt.s32.totalorder %s660_s17, 8 }
   0xc   : > { %s741_s25 = scalar_select %p113_p7, %s648_s14, %s115_s21  }
   0xd   : > { %p181_p10 = pnand %p474_p6, %p180_p9 }
   0xe   : > { %v244_v0 = vld [vmem:[%s836_s1] sm:$0xff] (!%p181_p10)  ;;  %v245_v1 = vld [vmem:[%s836_s1 + $0x8] sm:$0xff] (!%p181_p10)  ;;  %v246_v2 = vld [vmem:[%s836_s1 + $0x10] sm:$0xff] (!%p181_p10)  ;;  %v662_v3 = vmov (!%p181_p10), 0.0|0.0   ;;  %s756_s7 = smul.u32 (!%p181_p10), 3, %s652_s15  ;;  %vm663_vm0 = vmmov (!%p181_p10), 0  }
   0xf   : > { %184 = sbr.rel (%p181_p10) target bundleno = 274 (0x112), region = 32  ;;  %518 = vmatprep.subr.bf16.mxu1 (!%p181_p10), %v662_v3  ;;  %v513_v4 = vpack.c.bf16 (!%p181_p10), %v245_v1, %v244_v0  ;;  %512 = vmatprep.subr.bf16.mxu0 (!%p181_p10), %v662_v3  ;;  %v247_v5 = vld [vmem:[%s836_s1 + $0x18] sm:$0xff] (!%p181_p10)  ;;  %v664_v6 = vmov (!%p181_p10), 0.0   ;;  %vm255_vm1 = vcmask (!%p181_p10), 261120   ;;  %s212_s19 = sand.u32 (!%p181_p10), 1, %s644_s13  }
  0x10   : > { %506 = vmatprep.mubr.msk.f32.mxu1 (!%p181_p10), %vm663_vm0, %v664_v6  ;;  %503 = vmatprep.mubr.msk.f32.mxu0 (!%p181_p10), %vm663_vm0, %v664_v6  ;;  %v516_v7 = vpack.c.bf16 (!%p181_p10), %v247_v5, %v246_v2  ;;  %p220_p11 = scmp.lt.s32.totalorder (!%p181_p10), %s756_s7, 18  ;;  %s522_s21 = smul.u32 (!%p181_p10), 24, %s212_s19  ;;  %v476_v11 = vld [vmem:[%s837_s2] ss:$0 sm:$0xff] (!%p181_p10) }
  0x11   : > { %520 = vmatpush3.bf16.msra.mxu1 (!%p181_p10), %v513_v4  ;;  %514 = vmatpush3.bf16.msra.mxu0 (!%p181_p10), %v513_v4  ;;  %s770_s28 = scalar_lea.sflag (!%p181_p10), [#allocation3], %s212_s19 }
  0x12   : > { %519 = vmatprep.subr.bf16.mxu1 (!%p181_p10), %v662_v3  ;;  %515 = vmatprep.subr.bf16.mxu0 (!%p181_p10), %v662_v3  ;;  %s214_s27 = scalar_lea.vmem (!%p181_p10), [#allocation2], %s522_s21 }
  0x15   : > { %521 = vmatpush3.bf16.msra.mxu1 (!%p181_p10), %v516_v7  ;;  %517 = vmatpush3.bf16.msra.mxu0 (!%p181_p10), %v516_v7 }
  0x16   : > { %s221_s8 = scalar_select %p220_p11, %s756_s7, 18 }
  0x17   : > { %s357_s29 = ssub.s32 (%p728_p4), 19, %s756_s7 }
  0x18   : > { %s475_s9 = sshll.u32 %s221_s8, 3  ;;  %p358_p12 = scmp.lt.s32.totalorder (%p728_p4), %s357_s29, 3 }
  0x19   : > { %s223_s18 = scalar_lea.vmem %s835_s0, %s475_s9 }
  0x1a   : > { %v242_v8 = vld [vmem:[%s223_s18 + $0x8] sm:$0xff]  ;;  %v241_v9 = vld [vmem:[%s223_s18] sm:$0xff]  ;;  %v243_v10 = vld [vmem:[%s223_s18 + $0x10] sm:$0xff] }
  0x1b   : > { %507 = vmatmul.mubr.msk.f32.vlgmr.msra.gmra.mrb[0].mxu1 %vm255_vm1, %v242_v8  ;;  %504 = vmatmul.mubr.msk.f32.vlgmr.msra.gmra.mrb[0].mxu0 %vm255_vm1, %v241_v9 }
  0x1c   : > { %509 = vmatprep.mubr.msk.f32.mxu1 %vm663_vm0, %v664_v6 }
  0x1f   : > { %510 = vmatmul.mubr.msk.f32.gmra.mrb[2].mxu1 %vm255_vm1, %v243_v10 }
  0xee   : > { %v336_v12 = vpop.f32.mrb[0].mxu1  ;;  %v331_v13 = vpop.f32.mrb[0].mxu0 }
  0xef   : > { %v337_v14 = vadd.f32 %v476_v11, %v336_v12  ;;  %v508_v15 = vpop.f32.mrb[1].mxu1  ;;  %v332_v16 = vadd.f32 %v476_v11, %v331_v13  ;;  %v505_v17 = vpop.f32.mrb[1].mxu0  ;;  %355 = sbr.rel (!%p728_p4) target bundleno = 274 (0x112), region = 36 }
  0xf1   : > { %346 = vst [vmem:[%s214_s27 + $0x8] sm:$0xff] %v337_v14  ;;  %345 = vst [vmem:[%s214_s27] sm:$0xff] %v332_v16 }
  0xf2   : > { %v341_v18 = vpop.f32.mrb[2].mxu1 }
  0xf3   : > { %v342_v19 = vadd.f32 %v476_v11, %v341_v18  ;;  %v511_v20 = vpop.f32.mrb[3].mxu1 }
  0xf5   : > { %347 = vst [vmem:[%s214_s27 + $0x10] sm:$0xff] %v342_v19 }
  0xf6   : > { %s849_s29 = smov (!%p358_p12, %s357_s29), 3 }
  0xf7   : > { %s775_s30 = sshll.u32 %s849_s29, 7 }
  0xf8   : > { %s362_s4 = ssub.s32 384, %s775_s30 }
  0xf9   : > { %363 = vsyncadd %s770_s28, %s362_s4  ;;  %p481_p13 = scmp.ne.s32.totalorder %s775_s30, 0  ;;  %s487_s5 = smul.u32 384, %s652_s15 }
  0xfa   : > { %s369_s6 = sshll.u32 %s214_s27, 4  ;;  %s665_s10 = smov [#allocation2]   ;;  %s786_s6 = int_to_ptr.vmem [resolvable:$true] %s369_s6 }
  0xfb   : > { %s784_s9 = scalar_lea.hbm %s838_s3, %s487_s5  ;;  %s582_s7 = scalar_lea.vmem %s786_s6, %s775_s30 }
  0xfc   : > { %p583_p0 = scmp.ne.s32.totalorder %s786_s6, %s582_s7  ;;  %s586_s11 = sshll.u32 %s665_s10, 4  ;;  %s587_s11 = int_to_ptr.vmem [resolvable:$false] %s586_s11 }
  0xfd   : > { %s588_s15 = scalar_lea.vmem %s587_s11, 768  ;;  %p589_p3 = scmp.lt.s32.totalorder %s786_s6, %s587_s11 }
  0xfe   : > { %p584_p1 = pnand %p583_p0, %p481_p13  ;;  %p590_p4 = scmp.lt.s32.totalorder %s588_s15, %s582_s7 }
 0x100   : > { %p585_p2 = pneg %p584_p1  ;;  %p591_p5 = por %p590_p4, %p589_p3 }
 0x102   : > { %p592_p6 = pnand %p591_p5, %p585_p2 }
 0x104   : > { %595 = shalt.err (!%p592_p6)
}
 0x105   : > { %s596_s18 = scalar_lea.hbm %s784_s9, %s775_s30  ;;  %s600_s23 = scalar_lea.hbm %s838_s3, 2432 }
 0x106   : > { %p597_p7 = scmp.ne.s32.totalorder %s784_s9, %s596_s18  ;;  %p601_p11 = scmp.lt.u32.totalorder %s784_s9, %s838_s3 }
 0x107   : > { %p602_p12 = scmp.lt.u32.totalorder %s600_s23, %s596_s18  ;;  %p604_p1 = scmp.lt.u32.totalorder %s596_s18, %s784_s9 }
 0x108   : > { %p598_p9 = pnand %p597_p7, %p481_p13 }
 0x109   : > { %p603_p0 = por %p602_p12, %p601_p11 }
 0x10a   : > { %p599_p10 = pneg %p598_p9 }
 0x10b   : > { %p605_p2 = por %p604_p1, %p603_p0 }
 0x10d   : > { %p606_p3 = pnand %p605_p2, %p599_p10 }
 0x10f   : > { %609 = shalt.err (!%p606_p3)
}
 0x110   : > { %s666_s29 = smov 128   ;;  %s667_s4 = smov 8  }
 0x111   : > { %375 = dma.vmem_to_hbm [thread:$0]  (%p481_p13), %s786_s6, %s775_s30, %s784_s9, %s770_s28, %s666_s29, %s666_s29, %s667_s4  }
 0x112 PF: > { %p528_p4 = scmp.ge.s32.totalorder %s660_s17, 2  ;;  %s384_s5 = sand.u32 1, %s640_s12  }
 0x113   : > { %s385_s8 = scalar_lea.sflag [#allocation3], %s384_s5 }
 0x114   : > { %p525_p5 = pnand %p528_p4, %p735_p8 }
 0x116   : > { %635 = dma.done.wait (!%p525_p5), %s385_s8, 384  }
 0x117   : > { %637 = vsyncadd (!%p525_p5), %s385_s8, 4294966912  ;;  %s16_s17 = sadd.s32 1, %s660_s17   ;;  %s841_s12 = smov %s644_s13 }
 0x118   : > { %p13_p6 = scmp.ge.s32.totalorder %s16_s17, 9   ;;  %s842_s13 = smov %s648_s14 }
 0x119   : > { %s843_s14 = smov %s741_s25  ;;  %s844_s15 = smov %s656_s16 }
 0x11a   : > { %s845_s16 = smov %s847_s20  ;;  %15 = sbr.rel (!%p13_p6) target bundleno = 4 (0x4), region = 73 }
 0x121   :  { %390 = vsyncpa [#allocation3], 1 }
 0x122   :  { %392 = vsyncpa [#allocation3 + $0x1], 1 }

</bundles_post_ra>
